<compile_context>
chip_gen: v7x
topology: tpu7x:2x2x1
jax: 0.10.0
libtpu: 0.0.40
codegen_flags: <defaults>
</compile_context>

<pallas_src>
import math
import jax
import jax.numpy as jnp
from jax.experimental import pallas as pl
from jax.experimental.pallas import tpu as pltpu


def _round_up(x, m):
    return ((x + m - 1) // m) * m


def _cdiv(a, b):
    return (a + b - 1) // b


def node_apply_kernel(h_ref, w_ref, b_ref, o_ref):
    # Fully fused step: MXU matmul with f32 accumulation, f32 bias add, ReLU, cast.
    y = jnp.dot(h_ref[...], w_ref[...], preferred_element_type=jnp.float32)
    y = y + b_ref[...]
    o_ref[...] = jnp.maximum(y, 0.0).astype(o_ref.dtype)


def _derive_tiles(N, K, Fp, block_m, in_dsize, out_dsize, budget_bytes):
    """Pick (tm, tn) that are (8,128)-legal and fit the double-buffered VMEM budget."""
    # Row tile: multiple of 8, capped by N; ensure >=2 row tiles (v7x has 2 TensorCores).
    tm = max(8, _round_up(min(block_m, N), 8))
    if _cdiv(N, tm) < 2 and N > 8:
        tm = max(8, _round_up(_cdiv(N, 2), 8))

    def vmem_need(tm_, tn_):
        # double-buffered h tile + weight slab + output tile, plus the (8, tn) bias block
        return 2 * (tm_ * K * in_dsize + K * tn_ * in_dsize + tm_ * tn_ * out_dsize) + 8 * tn_ * 4

    # Output-feature tile: keep the whole padded width resident when it fits (the common GCN
    # case -> weight DMA'd exactly once); otherwise fall back to a 256/128-wide column tile.
    tn = Fp
    if vmem_need(tm, tn) > budget_bytes and Fp > 256:
        tn = 256 if Fp % 256 == 0 else 128
    while vmem_need(tm, tn) > budget_bytes and tm > 8:
        tm = max(8, _round_up(tm // 2, 8))
    return tm, tn


def node_apply(h, weight, bias, *, block_m=512, use_bf16=None):
    """h: [N, in_feats], weight: [out_feats, in_feats] (nn.Linear layout), bias: [out_feats]."""
    N, in_feats = h.shape
    out_feats = weight.shape[0]
    orig_dtype = h.dtype

    if use_bf16 is None:
        use_bf16 = orig_dtype == jnp.float32

    K = in_feats                             # contraction dim, used unpadded (full-dim block)
    Fp = _round_up(out_feats, 128)           # lane-dense padded output width

    # Weight: pre-transpose once to [K, Fp] (tiny pad along the output dim only).
    wp = jnp.pad(weight.T, ((0, 0), (0, Fp - out_feats)))
    # Bias stays f32 for the epilogue, laid out lane-dense as [1, Fp].
    bp = jnp.pad(bias.astype(jnp.float32), (0, Fp - out_feats)).reshape(1, Fp)

    hp = h
    if use_bf16:
        hp = hp.astype(jnp.bfloat16)
        wp = wp.astype(jnp.bfloat16)
    else:
        wp = wp.astype(hp.dtype)

    in_dsize = jnp.dtype(hp.dtype).itemsize
    out_dsize = jnp.dtype(orig_dtype).itemsize
    tm, tn = _derive_tiles(N, K, Fp, block_m, in_dsize, out_dsize, budget_bytes=24 << 20)

    grid = (_cdiv(N, tm), Fp // tn)          # (row tiles, output-feature tiles); both parallel

    out = pl.pallas_call(
        node_apply_kernel,
        out_shape=jax.ShapeDtypeStruct((N, Fp), orig_dtype),
        grid_spec=pltpu.PrefetchScalarGridSpec(
            num_scalar_prefetch=0,
            grid=grid,
            in_specs=[
                pl.BlockSpec((tm, K), lambda i, j: (i, 0)),   # h tile (ragged last tile masked)
                pl.BlockSpec((K, tn), lambda i, j: (0, j)),   # weight slab: VMEM-resident across rows
                pl.BlockSpec((1, tn), lambda i, j: (0, j)),   # bias, VMEM-resident
            ],
            out_specs=pl.BlockSpec((tm, tn), lambda i, j: (i, j)),
        ),
        compiler_params=pltpu.CompilerParams(
            dimension_semantics=("parallel", "parallel"),
            vmem_limit_bytes=32 << 20,
        ),
    )(hp, wp, bp)

    # Only the padded feature columns need slicing off; rows were never padded.
    return out[:, :out_feats]


if __name__ == "__main__":
    key = jax.random.PRNGKey(0)
    k_h, k_w, k_b = jax.random.split(key, 3)

    # Small but non-trivial shapes: non-128-multiple in_feats (160) exercises the unpadded
    # full-K block path; out_feats=40 exercises the lane padding (40 -> 128).
    N = 64
    in_feats = 160
    out_feats = 40

    # node.data['h']
    h = jax.random.normal(k_h, (N, in_feats), dtype=jnp.float32)

    # nn.Linear(in_feats, out_feats) default init: U(-bound, bound), bound = 1/sqrt(in_feats)
    bound = 1.0 / math.sqrt(in_feats)
    weight = jax.random.uniform(
        k_w, (out_feats, in_feats), minval=-bound, maxval=bound, dtype=jnp.float32
    )
    bias = jax.random.uniform(
        k_b, (out_feats,), minval=-bound, maxval=bound, dtype=jnp.float32
    )

    ref = jnp.maximum(
        jnp.dot(h, weight.T, precision=jax.lax.Precision.HIGHEST) + bias, 0.0
    )

    # Default path: bf16 MXU operands, f32 accumulation/epilogue, 2 row tiles x 1 out tile.
    out = node_apply(h, weight, bias)
    jax.block_until_ready(out)
    assert out.shape == (N, out_feats)
    assert jnp.allclose(out, ref, atol=3e-2, rtol=3e-2), float(jnp.max(jnp.abs(out - ref)))

    # Ragged row-tile path (N not a multiple of tm) with f32 operands.
    N2 = 50
    h2 = jax.random.normal(k_h, (N2, in_feats), dtype=jnp.float32)
    ref2 = jnp.maximum(
        jnp.dot(h2, weight.T, precision=jax.lax.Precision.HIGHEST) + bias, 0.0
    )
    out2 = node_apply(h2, weight, bias, block_m=32, use_bf16=False)
    jax.block_until_ready(out2)
    assert out2.shape == (N2, out_feats)
    assert jnp.allclose(out2, ref2, atol=3e-2, rtol=3e-2), float(jnp.max(jnp.abs(out2 - ref2)))

    print("KERNEL_OK")
</pallas_src>

<mosaic_0001>
module attributes {stable_mosaic.version = 11 : i64} {
  func.func @node_apply_kernel(%arg0: i32, %arg1: i32, %arg2: memref<32x160xbf16, #tpu.memory_space<vmem>>, %arg3: memref<160x128xbf16, #tpu.memory_space<vmem>>, %arg4: memref<1x128xf32, #tpu.memory_space<vmem>>, %arg5: memref<32x128xf32, #tpu.memory_space<vmem>>) attributes {dimension_semantics = [#tpu.dimension_semantics<parallel>, #tpu.dimension_semantics<parallel>], iteration_bounds = array<i64: 2, 1>, scalar_prefetch = 0 : i64, scratch_operands = 0 : i64, tpu.core_type = #tpu.core_type<tc>, window_params = [{transform_indices = @transform_0, window_bounds = array<i64: 32, 160>}, {transform_indices = @transform_1, window_bounds = array<i64: 160, 128>}, {transform_indices = @transform_2, window_bounds = array<i64: 1, 128>}, {transform_indices = @transform_3, window_bounds = array<i64: 32, 128>}]} {
    %c0 = arith.constant 0 : index
    %c0_0 = arith.constant 0 : index
    %0 = vector.load %arg2[%c0, %c0_0] : memref<32x160xbf16, #tpu.memory_space<vmem>>, vector<32x160xbf16>
    %c0_1 = arith.constant 0 : index
    %c0_2 = arith.constant 0 : index
    %1 = vector.load %arg3[%c0_1, %c0_2] : memref<160x128xbf16, #tpu.memory_space<vmem>>, vector<160x128xbf16>
    %cst = arith.constant dense<0.000000e+00> : vector<32x128xf32>
    %2 = tpu.matmul %0, %1, %cst {dimension_numbers = #tpu.dot_dimension_numbers<[1], [0], [0], [1], [0, 0, 1, 1], [], []>} : vector<32x160xbf16>, vector<160x128xbf16>, vector<32x128xf32> -> vector<32x128xf32>
    %c0_3 = arith.constant 0 : index
    %c0_4 = arith.constant 0 : index
    %3 = vector.load %arg4[%c0_3, %c0_4] : memref<1x128xf32, #tpu.memory_space<vmem>>, vector<1x128xf32>
    %4 = vector.broadcast %3 : vector<1x128xf32> to vector<32x128xf32>
    %5 = arith.addf %2, %4 : vector<32x128xf32>
    %cst_5 = arith.constant 0.000000e+00 : f32
    %6 = vector.broadcast %cst_5 : f32 to vector<32x128xf32>
    %7 = arith.maximumf %5, %6 : vector<32x128xf32>
    %c0_6 = arith.constant 0 : index
    %c0_7 = arith.constant 0 : index
    %8 = vector.load %arg5[%c0_6, %c0_7] : memref<32x128xf32, #tpu.memory_space<vmem>>, vector<32x128xf32>
    tpu.vector_store %arg5[%c0_6, %c0_7], %7 {strides = array<i32>} : memref<32x128xf32, #tpu.memory_space<vmem>>, vector<32x128xf32>,
    return
  }
  func.func @transform_0(%arg0: i32, %arg1: i32) -> (i32, i32) {
    %c0_i32 = arith.constant 0 : i32
    %c0_i32_0 = arith.constant 0 : i32
    return %arg0, %c0_i32 : i32, i32
  }
  func.func @transform_1(%arg0: i32, %arg1: i32) -> (i32, i32) {
    %c0_i32 = arith.constant 0 : i32
    %c0_i32_0 = arith.constant 0 : i32
    return %c0_i32, %arg1 : i32, i32
  }
  func.func @transform_2(%arg0: i32, %arg1: i32) -> (i32, i32) {
    %c0_i32 = arith.constant 0 : i32
    %c0_i32_0 = arith.constant 0 : i32
    return %c0_i32, %arg1 : i32, i32
  }
  func.func @transform_3(%arg0: i32, %arg1: i32) -> (i32, i32) {
    %c0_i32 = arith.constant 0 : i32
    return %arg0, %arg1 : i32, i32
  }
}

</mosaic_0001>

<bundles_post_ra>
// kernel: tpu_custom_call.1
= control target key start
LH: loop header
LB: loop body
LE: loop exit
PB: predicated region body
PF: predicated region fallthrough
CT: control target
= control target key end

     0   :  { %8 = vsyncpa [#allocation3], 0  ;;  %s1101_s0 = inlined_call_operand.hbm [shape: bf16[64,160], index: 0, kind: input, shape index: {}]   ;;  %s1102_s1 = inlined_call_operand.hbm [shape: bf16[160,128], index: 1, kind: input, shape index: {}]   ;;  %s1103_s2 = inlined_call_operand.vmem [shape: f32[1,128], index: 2, kind: input, shape index: {}]   ;;  %s1104_s3 = inlined_call_operand.hbm [shape: f32[64,128], index: 3, kind: output, shape index: {}]  }
   0x1   :  { %10 = vsyncpa [#allocation3 + $0x1], 0 }
   0x2   :  { %11 = vsyncpa [#allocation6], 0 }
   0x3   :  { %12 = vsyncpa [#allocation4], 0 }
   0x4   :  { %14 = vsyncpa [#allocation4 + $0x1], 0  ;;  %s869_s12 = smov 0   ;;  %s871_s13 = smov 0  }
   0x5   :  { %s873_s14 = smov 0   ;;  %s875_s15 = smov 0  }
   0x6   :  { %s877_s16 = smov 0   ;;  %s879_s17 = smov 0  }
   0x7 LB: > { %s538_s18 = sadd.s32 4294967295, %s837_s17   ;;  %s539_s19 = sadd.s32 4294967294, %s837_s17   ;;  %s837_s17 = sphi %s879_s17, %s20_s17   ;;  %s833_s16 = sphi %s877_s16, %s1128_s16   ;;  %s829_s15 = sphi %s875_s15, %s1127_s15   ;;  %s825_s14 = sphi %s873_s14, %s1126_s14   ;;  %s821_s13 = sphi %s871_s13, %s1125_s13   ;;  %s817_s12 = sphi %s869_s12, %s1124_s12  }
   0x8   : > { %p52_p0 = scmp.ne.s32.totalorder %s821_s13, %s817_s12  ;;  %p903_p1 = scmp.eq.s32.totalorder %s538_s18, 0 }
   0x9   : > { %p907_p2 = scmp.eq.s32.totalorder %s538_s18, 1  ;;  %p136_p3 = scmp.eq.s32.totalorder %s539_s19, 1 }
   0xa   : > { %s1109_s20 = scalar_select %p903_p1, 1, 0 }
   0xb   : > { %s1110_s21 = scalar_select %p907_p2, 1, 0 }
   0xc   : > { %p913_p4 = por %p903_p1, %p52_p0  ;;  %p540_p5 = scmp.ge.s32.totalorder %s837_s17, 1 }
   0xd   : > { %p918_p6 = por %p136_p3, %p52_p0  ;;  %p143_p7 = scmp.lt.s32.totalorder %s837_s17, 3 }
   0xe   : > { %s1111_s22 = scalar_select %p913_p4, 1, 0 }
   0xf   : > { %s1112_s23 = scalar_select %p918_p6, 1, 0 }
  0x10   : > { %p923_p8 = pnand %p540_p5, %p143_p7  ;;  %s839_s25 = smov [#allocation5]  }
  0x11   : > { %s157_s26 = sshll.u32 %s839_s25, 4  ;;  %s32_s28 = sadd.s32 1, %s833_s16  ;;  %s158_s26 = int_to_ptr.vmem [resolvable:$true] %s157_s26 }
  0x12   : > { %s1113_s24 = scalar_select %p923_p8, 1, 0 }
  0x13   : > { %p605_p9 = pneg %p923_p8  ;;  %s693_s4 = scalar_lea.hbm %s1102_s1, 1280 }
  0x14   : > { %p694_p12 = scmp.ne.s32.totalorder %s1102_s1, %s693_s4  ;;  %p700_p5 = scmp.lt.u32.totalorder %s693_s4, %s1102_s1 }
  0x15   : > { %p932_p11 = pnand %p605_p9, %p903_p1 }
  0x17   : > { %p695_p13 = pneg %p932_p11 }
  0x19   : > { %p696_p0 = pnand %p695_p13, %p694_p12 }
  0x1b   : > { %p697_p3 = pneg %p696_p0 }
  0x1d   : > { %p702_p7 = pnand %p700_p5, %p697_p3 }
  0x1f   : > { %705 = shalt.err (!%p702_p7)
}
  0x20   : > { %s706_s9 = scalar_lea.vmem %s158_s26, 1280  ;;  %p714_p1 = scmp.lt.s32.totalorder %s158_s26, %s158_s26 }
  0x21   : > { %p707_p9 = scmp.ne.s32.totalorder %s158_s26, %s706_s9  ;;  %p715_p4 = scmp.lt.s32.totalorder %s706_s9, %s706_s9 }
  0x23   : > { %p709_p10 = pnand %p707_p9, %p695_p13  ;;  %p716_p8 = por %p715_p4, %p714_p1 }
  0x25   : > { %p710_p6 = pneg %p709_p10 }
  0x27   : > { %p717_p2 = pnand %p716_p8, %p710_p6 }
  0x29   : > { %720 = shalt.err (!%p717_p2)
}
  0x2a   : > { %s840_s10 = smov 64   ;;  %s841_s11 = smov 4  }
  0x2b   : > { %608 = dma.hbm_to_vmem [thread:$0]  (!%p932_p11), %s1102_s1, 1280, %s158_s26, [#allocation6], %s840_s10, %s840_s10, %s841_s11  }
  0x2c   : > { %p34_p1 = scmp.ge.s32.totalorder %s32_s28, 2  ;;  %s39_s25 = sadd.s32 1, %s825_s14 }
  0x2d   : > { %p46_p2 = scmp.ne.s32.totalorder %s825_s14, %s821_s13  ;;  %p47_p4 = scmp.eq.s32.totalorder %s837_s17, 0 }
  0x2e   : > { %s1130_s28 = smov (%p34_p1, %s32_s28), 0  ;;  %p1116_p8 = scmp.ne.s32.totalorder %s1110_s21, 0 }
  0x2f   : > { %p959_p6 = por %p47_p4, %p46_p2  ;;  %s36_s27 = ssub.s32 %s833_s16, %s1130_s28 }
  0x30   : > { %p965_p10 = por %p1116_p8, %p46_p2  ;;  %p618_p12 = scmp.lt.s32.totalorder %s837_s17, 2 }
  0x31   : > { %p37_p11 = scmp.eq.s32.totalorder %s36_s27, 0  ;;  %s177_s26 = sand.u32 1, %s825_s14  }
  0x32   : > { %s544_s4 = sshll.u32 %s177_s26, 5  ;;  %s575_s6 = sshll.u32 %s833_s16, 9 }
  0x33   : > { %s974_s5 = scalar_select %p37_p11, %s825_s14, %s39_s25  }
  0x34   : > { %s980_s9 = scalar_lea.hbm %s1101_s0, %s575_s6  ;;  %s181_s21 = scalar_lea.vmem [#allocation2], %s544_s4 }
  0x35   : > { %s189_s10 = sshll.u32 %s181_s21, 4  ;;  %p986_p13 = pnand %p618_p12, %p959_p6  ;;  %s982_s10 = int_to_ptr.vmem [resolvable:$true] %s189_s10 }
  0x36   : > { %s990_s18 = scalar_lea.sflag [#allocation3], %s177_s26  ;;  %s721_s19 = scalar_lea.hbm %s980_s9, 512 }
  0x37   : > { %p722_p0 = scmp.ne.s32.totalorder %s980_s9, %s721_s19  ;;  %p723_p3 = pneg %p986_p13 }
  0x38   : > { %s726_s29 = scalar_lea.hbm %s1101_s0, 1024  ;;  %p727_p9 = scmp.lt.u32.totalorder %s980_s9, %s1101_s0 }
  0x39   : > { %p724_p5 = pnand %p723_p3, %p722_p0  ;;  %p728_p1 = scmp.lt.u32.totalorder %s726_s29, %s721_s19 }
  0x3a   : > { %p730_p4 = scmp.lt.u32.totalorder %s721_s19, %s980_s9 }
  0x3b   : > { %p725_p7 = pneg %p724_p5  ;;  %p729_p2 = por %p728_p1, %p727_p9 }
  0x3d   : > { %p731_p6 = por %p730_p4, %p729_p2 }
  0x3f   : > { %p732_p8 = pnand %p731_p6, %p725_p7 }
  0x41   : > { %735 = shalt.err (!%p732_p8)
}
  0x42   : > { %s736_s26 = scalar_lea.vmem %s982_s10, 512  ;;  %s842_s7 = smov [#allocation2]  }
  0x43   : > { %p737_p12 = scmp.ne.s32.totalorder %s982_s10, %s736_s26  ;;  %s741_s8 = sshll.u32 %s842_s7, 4  ;;  %s742_s8 = int_to_ptr.vmem [resolvable:$false] %s741_s8 }
  0x44   : > { %s743_s21 = scalar_lea.vmem %s742_s8, 1024  ;;  %p744_p5 = scmp.lt.s32.totalorder %s982_s10, %s742_s8 }
  0x45   : > { %p739_p11 = pnand %p737_p12, %p723_p3  ;;  %p745_p9 = scmp.lt.s32.totalorder %s743_s21, %s736_s26 }
  0x47   : > { %p740_p0 = pneg %p739_p11  ;;  %p746_p1 = por %p745_p9, %p744_p5 }
  0x49   : > { %p747_p2 = pnand %p746_p1, %p740_p0 }
  0x4b   : > { %750 = shalt.err (!%p747_p2)
}
  0x4c   : > { %s843_s19 = smov 128   ;;  %s844_s25 = smov 8  }
  0x4d   : > { %612 = dma.hbm_to_vmem [thread:$0]  (!%p986_p13), %s980_s9, 512, %s982_s10, %s990_s18, %s843_s19, %s843_s19, %s844_s25  }
  0x4e   : > { %p1119_p3 = scmp.ne.s32.totalorder %s1113_s24, 0 }
  0x4f   : > { %s1021_s27 = sand.u32 (!%p1119_p3), 1, %s821_s13   ;;  %p1120_p7 = scmp.ne.s32.totalorder (!%p1119_p3), %s1111_s22, 0 }
  0x50   : > { %201 = sbr.rel (%p1119_p3) target bundleno = 365 (0x16d), region = 32  ;;  %s549_s29 = sshll.u32 (!%p1119_p3), %s1021_s27, 5 }
  0x51   : > { %s204_s4 = scalar_lea.sflag (!%p1119_p3), [#allocation3], %s1021_s27  ;;  %s1027_s6 = scalar_lea.vmem (!%p1119_p3), [#allocation2], %s549_s29 }
  0x57   : > { %804 = dma.done.wait (%p1120_p7), %s204_s4, 512  }
  0x58   : > { %806 = vsyncadd (%p1120_p7), %s204_s4, 4294966784  ;;  %p1121_p13 = scmp.ne.s32.totalorder %s1109_s20, 0 }
  0x5a   : > { %808 = dma.done.wait (%p1121_p13), [#allocation6], 1280  }
  0x5b   : > { %810 = vsyncadd (%p1121_p13), [#allocation6], 4294966016  ;;  %v845_v0 = vmov 0   ;;  %v677_v1 = vld [vmem:[#allocation5] sm:$0xff]   ;;  %v678_v2 = vld [vmem:[#allocation5 + $0x8] sm:$0xff]   ;;  %vm352_vm0 = vcmask 261120  }
  0x5c   : > { %359 = vmatprep.subr.bf16.mxu0 %v845_v0  ;;  %577 = vmatprep.subr.bf16.mxu1 %v845_v0  ;;  %v679_v3 = vld [vmem:[#allocation5 + $0x10] sm:$0xff]   ;;  %v680_v4 = vld [vmem:[#allocation5 + $0x18] sm:$0xff]   ;;  %v689_v5 = vld [vmem:[%s1027_s6 + $0x4] ss:$8 sps:$4 sm:$0xff]   ;;  %s236_s24 = scalar_lea.vmem [#allocation7], %s549_s29  ;;  %s576_s10 = sshll.u32 %s829_s15, 9 }
  0x5d   : > { %360 = vmatpush1.bf16.msra.mxu0 %v677_v1  ;;  %587 = vmatpush1.bf16.msra.mxu1 %v677_v1  ;;  %v692_v6 = vld [vmem:[%s1027_s6 + $0x14] ss:$8 sps:$4 sm:$0xff]   ;;  %v681_v7 = vld [vmem:[#allocation5 + $0x20] sm:$0xff]   ;;  %v682_v8 = vld [vmem:[#allocation5 + $0x28] sm:$0xff]   ;;  %s431_s9 = sshll.u32 %s236_s24, 4  ;;  %s1052_s26 = scalar_lea.hbm %s1104_s3, %s576_s10  ;;  %s1047_s9 = int_to_ptr.vmem [resolvable:$true] %s431_s9 }
  0x5e   : > { %361 = vmatprep.subr.bf16.mxu0 %v845_v0  ;;  %578 = vmatprep.subr.bf16.mxu1 %v845_v0  ;;  %v683_v9 = vld [vmem:[#allocation5 + $0x30] sm:$0xff]   ;;  %v684_v10 = vld [vmem:[#allocation5 + $0x38] sm:$0xff]   ;;  %v685_v11 = vld [vmem:[#allocation5 + $0x40] sm:$0xff]   ;;  %s417_s15 = scalar_lea.sflag [#allocation4], %s1021_s27  ;;  %s751_s7 = scalar_lea.vmem %s1047_s9, 512 }
  0x5f   : > { %567 = vmatprep.mubr.msk.bf16.mxu0 %vm352_vm0, %v689_v5  ;;  %568 = vmatprep.mubr.msk.bf16.mxu1 %vm352_vm0, %v692_v6  ;;  %v686_v12 = vld [vmem:[#allocation5 + $0x48] sm:$0xff]   ;;  %v690_v14 = vld [vmem:[%s1027_s6 + $0x10] ss:$8 sps:$4 sm:$0xff]   ;;  %v552_v15 = vld [vmem:[%s1103_s2] ss:$0 sm:$0xff]  ;;  %p752_p4 = scmp.ne.s32.totalorder %s1047_s9, %s751_s7  ;;  %s846_s8 = smov [#allocation7]  }
  0x60   : > { %v687_v13 = vld [vmem:[%s1027_s6] ss:$8 sps:$4 sm:$0xff]   ;;  %s755_s21 = sshll.u32 %s846_s8, 4  ;;  %s756_s21 = int_to_ptr.vmem [resolvable:$false] %s755_s21 }
  0x61   : > { %362 = vmatpush1.bf16.msra.mxu0 %v678_v2  ;;  %588 = vmatpush1.bf16.msra.mxu1 %v678_v2  ;;  %p753_p6 = pnand %p752_p4, %p965_p10  ;;  %s757_s19 = scalar_lea.vmem %s756_s21, 1024 }
  0x62   : > { %363 = vmatprep.subr.bf16.mxu0 %v845_v0  ;;  %579 = vmatprep.subr.bf16.mxu1 %v845_v0  ;;  %p758_p12 = scmp.lt.s32.totalorder %s1047_s9, %s756_s21  ;;  %p759_p11 = scmp.lt.s32.totalorder %s757_s19, %s751_s7 }
  0x63   : > { %p754_p8 = pneg %p753_p6 }
  0x64   : > { %p760_p0 = por %p759_p11, %p758_p12 }
  0x65   : > { %364 = vmatpush1.bf16.msra.mxu0 %v679_v3  ;;  %589 = vmatpush1.bf16.msra.mxu1 %v679_v3 }
  0x66   : > { %365 = vmatprep.subr.bf16.mxu0 %v845_v0  ;;  %580 = vmatprep.subr.bf16.mxu1 %v845_v0  ;;  %p761_p5 = pnand %p760_p0, %p754_p8 }
  0x69   : > { %366 = vmatpush1.bf16.msra.mxu0 %v680_v4  ;;  %590 = vmatpush1.bf16.msra.mxu1 %v680_v4 }
  0x6a   : > { %367 = vmatprep.subr.bf16.mxu0 %v845_v0  ;;  %581 = vmatprep.subr.bf16.mxu1 %v845_v0 }
  0x6d   : > { %368 = vmatpush1.bf16.msra.mxu0 %v681_v7  ;;  %591 = vmatpush1.bf16.msra.mxu1 %v681_v7 }
  0x6e   : > { %369 = vmatprep.subr.bf16.mxu0 %v845_v0  ;;  %582 = vmatprep.subr.bf16.mxu1 %v845_v0 }
  0x71   : > { %370 = vmatpush1.bf16.msra.mxu0 %v682_v8  ;;  %592 = vmatpush1.bf16.msra.mxu1 %v682_v8 }
  0x72   : > { %371 = vmatprep.subr.bf16.mxu0 %v845_v0  ;;  %583 = vmatprep.subr.bf16.mxu1 %v845_v0 }
  0x75   : > { %372 = vmatpush1.bf16.msra.mxu0 %v683_v9  ;;  %593 = vmatpush1.bf16.msra.mxu1 %v683_v9 }
  0x76   : > { %373 = vmatprep.subr.bf16.mxu0 %v845_v0  ;;  %584 = vmatprep.subr.bf16.mxu1 %v845_v0 }
  0x79   : > { %374 = vmatpush1.bf16.msra.mxu0 %v684_v10  ;;  %594 = vmatpush1.bf16.msra.mxu1 %v684_v10 }
  0x7a   : > { %375 = vmatprep.subr.bf16.mxu0 %v845_v0  ;;  %585 = vmatprep.subr.bf16.mxu1 %v845_v0 }
  0x7d   : > { %376 = vmatpush1.bf16.msra.mxu0 %v685_v11  ;;  %595 = vmatpush1.bf16.msra.mxu1 %v685_v11 }
  0x7e   : > { %377 = vmatprep.subr.bf16.mxu0 %v845_v0  ;;  %586 = vmatprep.subr.bf16.mxu1 %v845_v0 }
  0x81   : > { %378 = vmatpush1.bf16.msra.mxu0 %v686_v12  ;;  %596 = vmatpush1.bf16.msra.mxu1 %v686_v12 }
  0x84   : > { %392 = vmatmul.mubr.bf16.vlgmr.msra.gmra.mrb[0].mxu0 %v687_v13  ;;  %400 = vmatmul.mubr.bf16.vlgmr.msra.gmra.mrb[0].mxu1 %v690_v14 }
 0x157   : > { %v393_v16 = vpop.f32.mrb[0].mxu0  ;;  %v401_v17 = vpop.f32.mrb[0].mxu1 }
 0x158   : > { %v394_v18 = vadd.f32 %v552_v15, %v393_v16  ;;  %v402_v19 = vadd.f32 %v552_v15, %v401_v17  ;;  %v395_v20 = vpop.f32.mrb[1].mxu0  ;;  %v403_v21 = vpop.f32.mrb[1].mxu1 }
 0x159   : > { %v396_v22 = vpop.f32.mrb[2].mxu0  ;;  %v404_v23 = vpop.f32.mrb[2].mxu1 }
 0x15a   : > { %v408_v24 = vmax.f32 %v394_v18, 0.0  ;;  %v410_v25 = vmax.f32 %v402_v19, 0.0  ;;  %v397_v26 = vadd.f32 %v552_v15, %v396_v22  ;;  %v405_v27 = vadd.f32 %v552_v15, %v404_v23  ;;  %v398_v28 = vpop.f32.mrb[3].mxu0  ;;  %v406_v29 = vpop.f32.mrb[3].mxu1 }
 0x15c   : > { %412 = vst [vmem:[%s236_s24] sm:$0xff] %v408_v24  ;;  %414 = vst [vmem:[%s236_s24 + $0x10] sm:$0xff] %v410_v25  ;;  %v409_v30 = vmax.f32 %v397_v26, 0.0  ;;  %v411_v31 = vmax.f32 %v405_v27, 0.0 }
 0x15e   : > { %413 = vst [vmem:[%s236_s24 + $0x8] sm:$0xff] %v409_v30  ;;  %415 = vst [vmem:[%s236_s24 + $0x18] sm:$0xff] %v411_v31 }
 0x15f   : > { %764 = shalt.err (!%p761_p5)
}
 0x160   : > { %s765_s25 = scalar_lea.hbm %s1052_s26, 512  ;;  %s769_s6 = scalar_lea.hbm %s1104_s3, 1024 }
 0x161   : > { %p766_p9 = scmp.ne.s32.totalorder %s1052_s26, %s765_s25  ;;  %p770_p3 = scmp.lt.u32.totalorder %s1052_s26, %s1104_s3 }
 0x162   : > { %p771_p7 = scmp.lt.u32.totalorder %s769_s6, %s765_s25  ;;  %p773_p4 = scmp.lt.u32.totalorder %s765_s25, %s1052_s26 }
 0x163   : > { %p767_p1 = pnand %p766_p9, %p965_p10 }
 0x164   : > { %p772_p13 = por %p771_p7, %p770_p3 }
 0x165   : > { %p768_p2 = pneg %p767_p1 }
 0x166   : > { %p774_p6 = por %p773_p4, %p772_p13 }
 0x168   : > { %p775_p8 = pnand %p774_p6, %p768_p2 }
 0x16a   : > { %778 = shalt.err (!%p775_p8)
}
 0x16b   : > { %s847_s24 = smov 128   ;;  %s848_s10 = smov 8  }
 0x16c   : > { %603 = dma.vmem_to_hbm [thread:$0]  (%p965_p10), %s1047_s9, 512, %s1052_s26, %s417_s15, %s847_s24, %s847_s24, %s848_s10  }
 0x16d PF: > { %s446_s11 = sand.u32 1, %s817_s12   ;;  %p1122_p12 = scmp.ne.s32.totalorder %s1112_s23, 0 }
 0x16e   : > { %p1123_p11 = scmp.ge.s32.totalorder %s837_s17, 2  ;;  %s447_s18 = scalar_lea.sflag [#allocation4], %s446_s11 }
 0x170   : > { %p614_p0 = pnand %p1123_p11, %p1122_p12 }
 0x172   : > { %812 = dma.done.wait (!%p614_p0), %s447_s18, 512  }
 0x173   : > { %814 = vsyncadd (!%p614_p0), %s447_s18, 4294966784  ;;  %s20_s17 = sadd.s32 1, %s837_s17   ;;  %s1124_s12 = smov %s821_s13 }
 0x174   : > { %p17_p5 = scmp.ge.s32.totalorder %s20_s17, 4   ;;  %s1125_s13 = smov %s825_s14 }
 0x175   : > { %s1126_s14 = smov %s974_s5  ;;  %s1127_s15 = smov %s833_s16 }
 0x176   : > { %s1128_s16 = smov %s1130_s28  ;;  %19 = sbr.rel (!%p17_p5) target bundleno = 7 (0x7), region = 85 }
 0x17d   :  { %452 = vsyncpa [#allocation3], 1 }
 0x17e   :  { %454 = vsyncpa [#allocation3 + $0x1], 1 }
 0x17f   :  { %455 = vsyncpa [#allocation6], 1 }
 0x180   :  { %456 = vsyncpa [#allocation4], 1 }
 0x181   :  { %458 = vsyncpa [#allocation4 + $0x1], 1 }

</bundles_post_ra>
